<compile_context>
chip_gen: v7x
topology: tpu7x:2x2x1
jax: 0.10.0
libtpu: 0.0.40
codegen_flags: <defaults>
</compile_context>

<pallas_src>
import functools

import jax
import jax.numpy as jnp
from jax.experimental import pallas as pl
from jax.experimental.pallas import tpu as pltpu


# ------------------------------ fused kernel --------------------------------

def _fused_stack_kernel(x_ref, *refs, num_layers, norm, relu_flags, eps):
    """One grid step == one block of channels: runs x[:, c0:c0+cb, :, :] through all layers.

    refs = (w_0, b_0, ..., w_{L-1}, b_{L-1}, [gammas, betas,] o_ref)
      w_i: (F_i, F_{i+1}) VMEM, b_i: (1, F_{i+1}) VMEM,
      gammas/betas: (L, c_blk, 1, F) VMEM (batch norm only, constant along F),
      o_ref: (B, c_blk, H, F_last) VMEM.
    """
    if norm == "batch":
        o_ref = refs[-1]
        gam_ref, bet_ref = refs[-3], refs[-2]
        wb_refs = refs[:-3]
    else:
        o_ref = refs[-1]
        gam_ref = bet_ref = None
        wb_refs = refs[:-1]

    B, CB, H, F0 = x_ref.shape
    rows = B * CB * H
    # One big (rows, F) slab: the whole channel block shares every matmul (better MXU
    # row occupancy than per-channel tiny matmuls). Leading-dim reshapes are cheap
    # (the lane/feature axis never moves).
    h = x_ref[...].reshape(rows, F0).astype(jnp.float32)

    for i in range(num_layers):
        w = wb_refs[2 * i][...].astype(jnp.float32)
        b = wb_refs[2 * i + 1][...].astype(jnp.float32)          # (1, F_out)
        f_out = w.shape[1]

        # ---- Linear on the last axis (MXU) ----
        y = jnp.dot(h, w, preferred_element_type=jnp.float32) + b  # (rows, F_out)

        # ---- Norm (batch statistics, training-mode forward) ----
        if norm == "batch":
            # BatchNorm2d: per-channel stats over (N, H, W_feat). Channels sit on axis 1
            # of the 4-D view; each channel is fully contained in this grid step, so the
            # statistics are exact.
            y4 = y.reshape(B, CB, H, f_out)
            inv_n = 1.0 / float(B * H * f_out)
            s = jnp.sum(y4, axis=3, keepdims=True)               # lane reduce (XLU)
            s = jnp.sum(s, axis=2, keepdims=True)
            s = jnp.sum(s, axis=0, keepdims=True)                # (1, CB, 1, 1)
            ss = jnp.sum(y4 * y4, axis=3, keepdims=True)
            ss = jnp.sum(ss, axis=2, keepdims=True)
            ss = jnp.sum(ss, axis=0, keepdims=True)
            mean = s * inv_n
            var = ss * inv_n - mean * mean                       # one-pass biased var
            g4 = gam_ref[i]                                      # (CB, 1, F_out), const along F
            b4 = bet_ref[i]
            scale = jax.lax.rsqrt(var + eps) * g4                # (1, CB, 1, F_out)
            y = ((y4 - mean) * scale + b4).reshape(rows, f_out)
        elif norm == "instance":
            # InstanceNorm2d (affine=False): stats per (n, c) over (H, W_feat).
            y4 = y.reshape(B, CB, H, f_out)
            inv_n = 1.0 / float(H * f_out)
            s = jnp.sum(y4, axis=3, keepdims=True)
            s = jnp.sum(s, axis=2, keepdims=True)                # (B, CB, 1, 1)
            ss = jnp.sum(y4 * y4, axis=3, keepdims=True)
            ss = jnp.sum(ss, axis=2, keepdims=True)
            mean = s * inv_n
            var = ss * inv_n - mean * mean
            y = ((y4 - mean) * jax.lax.rsqrt(var + eps)).reshape(rows, f_out)

        # ---- ReLU (fused) ----
        if relu_flags[i]:
            y = jnp.maximum(y, 0.0)
        h = y

    Bo, CBo, Ho, Fo = o_ref.shape
    # TODO(synk): for large production shapes with narrow F_last, emit a lane-dense
    # channel-major output slab + wrapper-side transpose to avoid masked narrow stores;
    # at F_last=4 toy shapes the NCHW block cannot be lane-dense anyway.
    o_ref[...] = h.reshape(Bo, CBo, Ho, Fo).astype(o_ref.dtype)


def _pick_channel_block(B, C, H, nkernels, vmem_budget_bytes=8 << 20):
    """Largest divisor of C whose block (double-buffered in + live f32 activations) fits VMEM."""
    f_max = max(nkernels)
    per_channel = 4 * B * H * (2 * nkernels[0] + 3 * f_max)   # rough f32 footprint / channel
    c_blk = max(1, min(C, vmem_budget_bytes // max(per_channel, 1)))
    while C % c_blk:
        c_blk -= 1
    return int(c_blk)


# --------------------------- LinearLayer wrapper ----------------------------

class LinearLayerPallas:
    """JAX/Pallas port of models.networks.blocks.LinearLayer (training-mode norms)."""

    def __init__(self, nkernels, norm="batch", last_relu=False, key=None):
        assert norm in ("batch", "instance", "none")
        self.nkernels = list(nkernels)
        self.norm = norm
        self.last_relu = last_relu
        self.eps = 1e-5

        key = jax.random.PRNGKey(0) if key is None else key
        self.weights = []    # (w (K,N), b (1,N)) -- w is torch Linear weight transposed
        self.bn_params = []  # (gamma (N,), beta (N,)) for batch norm
        for i in range(len(nkernels) - 1):
            fan_in, fan_out = nkernels[i], nkernels[i + 1]
            key, kw, kb = jax.random.split(key, 3)
            bound = 1.0 / float(fan_in) ** 0.5   # PyTorch default Linear init range
            w = jax.random.uniform(kw, (fan_in, fan_out), jnp.float32, -bound, bound)
            b = jax.random.uniform(kb, (1, fan_out), jnp.float32, -bound, bound)
            self.weights.append((w, b))
            self.bn_params.append((jnp.ones((fan_out,), jnp.float32),
                                   jnp.zeros((fan_out,), jnp.float32)))

    def _relu_flag(self, i):
        if self.last_relu:
            return True
        return i < len(self.nkernels) - 2

    def __call__(self, x, channel_block=None):
        # x: (B, C, H, W) with W == nkernels[0]
        assert x.ndim == 4 and x.shape[-1] == self.nkernels[0]
        B, C, H, F0 = x.shape
        L = len(self.weights)
        F_last = self.nkernels[-1]
        relu_flags = tuple(bool(self._relu_flag(i)) for i in range(L))

        c_blk = channel_block or _pick_channel_block(B, C, H, self.nkernels)
        grid = (C // c_blk,)

        inputs = [x]
        in_specs = [pl.BlockSpec((B, c_blk, H, F0), lambda cb: (0, cb, 0, 0))]
        for (w, b) in self.weights:
            inputs.append(w)
            in_specs.append(pl.BlockSpec(w.shape, lambda cb: (0, 0)))   # resident across grid
            inputs.append(b)
            in_specs.append(pl.BlockSpec(b.shape, lambda cb: (0, 0)))

        if self.norm == "batch":
            for i in range(L):
                assert self.nkernels[i + 1] == C, \
                    "BatchNorm2d(num_features) must equal channel dim C"
            g = jnp.stack([g for (g, _) in self.bn_params])      # (L, C) indexed by channel
            bt = jnp.stack([b2 for (_, b2) in self.bn_params])   # (L, C)
            F = C  # batch norm forces F_out == C for every layer
            g4 = jnp.broadcast_to(g[:, :, None, None], (L, C, 1, F))
            b4 = jnp.broadcast_to(bt[:, :, None, None], (L, C, 1, F))
            inputs += [g4, b4]
            in_specs += [pl.BlockSpec((L, c_blk, 1, F), lambda cb: (0, cb, 0, 0))] * 2

        kernel = functools.partial(
            _fused_stack_kernel, num_layers=L, norm=self.norm,
            relu_flags=relu_flags, eps=self.eps)

        return pl.pallas_call(
            kernel,
            out_shape=jax.ShapeDtypeStruct((B, C, H, F_last), x.dtype),
            grid=grid,
            in_specs=in_specs,
            out_specs=pl.BlockSpec((B, c_blk, H, F_last), lambda cb: (0, cb, 0, 0)),
            compiler_params=pltpu.CompilerParams(
                dimension_semantics=("parallel",)),
        )(*inputs)


# ------------------------------ pure-JAX ref --------------------------------

def _reference(layer, x):
    for i, (w, b) in enumerate(layer.weights):
        relu = layer._relu_flag(i)
        x = x @ w + b
        if layer.norm == "batch":
            gamma, beta = layer.bn_params[i]
            mean = jnp.mean(x, axis=(0, 2, 3), keepdims=True)
            var = jnp.mean((x - mean) ** 2, axis=(0, 2, 3), keepdims=True)
            x = (x - mean) / jnp.sqrt(var + layer.eps)
            x = x * gamma.reshape(1, -1, 1, 1) + beta.reshape(1, -1, 1, 1)
        elif layer.norm == "instance":
            mean = jnp.mean(x, axis=(2, 3), keepdims=True)
            var = jnp.mean((x - mean) ** 2, axis=(2, 3), keepdims=True)
            x = (x - mean) / jnp.sqrt(var + layer.eps)
        if relu:
            x = jnp.maximum(x, 0.0)
    return x


# ----------------------------------- main -----------------------------------

if __name__ == "__main__":
    key = jax.random.PRNGKey(0)
    k_param, k_x = jax.random.split(key)

    # Small shapes consistent with the module: nkernels=[32, 4, 4],
    # input (B=2, C=4, H=8, W=32); batch norm requires C == nkernels[i+1].
    nkernels = [32, 4, 4]
    B, C, H = 2, 4, 8
    x = jax.random.normal(k_x, (B, C, H, nkernels[0]), jnp.float32)

    configs = [("batch", False), ("instance", False), ("none", False), ("batch", True)]
    for norm, last_relu in configs:
        layer = LinearLayerPallas(nkernels, norm=norm, last_relu=last_relu, key=k_param)
        y = jax.block_until_ready(layer(x))
        assert y.shape == (B, C, H, nkernels[-1]), (norm, y.shape)
        y_ref = _reference(layer, x)
        err = float(jnp.max(jnp.abs(y - y_ref)))
        assert jnp.allclose(y, y_ref, atol=1e-4, rtol=1e-4), (norm, last_relu, err)

    print("KERNEL_OK")
</pallas_src>

<mosaic_0001>
module attributes {stable_mosaic.version = 11 : i64} {
  func.func @_fused_stack_kernel(%arg0: i32, %arg1: memref<2x4x8x32xf32, #tpu.memory_space<vmem>>, %arg2: memref<32x4xf32, #tpu.memory_space<vmem>>, %arg3: memref<1x4xf32, #tpu.memory_space<vmem>>, %arg4: memref<4x4xf32, #tpu.memory_space<vmem>>, %arg5: memref<1x4xf32, #tpu.memory_space<vmem>>, %arg6: memref<2x4x1x4xf32, #tpu.memory_space<vmem>>, %arg7: memref<2x4x1x4xf32, #tpu.memory_space<vmem>>, %arg8: memref<2x4x8x4xf32, #tpu.memory_space<vmem>>) attributes {dimension_semantics = [#tpu.dimension_semantics<parallel>], iteration_bounds = array<i64: 1>, scalar_prefetch = 0 : i64, scratch_operands = 0 : i64, tpu.core_type = #tpu.core_type<tc>, window_params = [{transform_indices = @transform_0, window_bounds = array<i64: 2, 4, 8, 32>}, {pipeline_mode = #tpu.pipeline_mode<synchronous>, transform_indices = @transform_1, window_bounds = array<i64: 32, 4>}, {pipeline_mode = #tpu.pipeline_mode<synchronous>, transform_indices = @transform_2, window_bounds = array<i64: 1, 4>}, {pipeline_mode = #tpu.pipeline_mode<synchronous>, transform_indices = @transform_3, window_bounds = array<i64: 4, 4>}, {pipeline_mode = #tpu.pipeline_mode<synchronous>, transform_indices = @transform_4, window_bounds = array<i64: 1, 4>}, {transform_indices = @transform_5, window_bounds = array<i64: 2, 4, 1, 4>}, {transform_indices = @transform_6, window_bounds = array<i64: 2, 4, 1, 4>}, {transform_indices = @transform_7, window_bounds = array<i64: 2, 4, 8, 4>}]} {
    %c0 = arith.constant 0 : index
    %c0_0 = arith.constant 0 : index
    %c0_1 = arith.constant 0 : index
    %c0_2 = arith.constant 0 : index
    %0 = vector.load %arg1[%c0, %c0_0, %c0_1, %c0_2] : memref<2x4x8x32xf32, #tpu.memory_space<vmem>>, vector<2x4x8x32xf32>
    %1 = vector.shape_cast %0 : vector<2x4x8x32xf32> to vector<64x32xf32>
    %c0_3 = arith.constant 0 : index
    %c0_4 = arith.constant 0 : index
    %2 = vector.load %arg2[%c0_3, %c0_4] : memref<32x4xf32, #tpu.memory_space<vmem>>, vector<32x4xf32>
    %c0_5 = arith.constant 0 : index
    %c0_6 = arith.constant 0 : index
    %3 = vector.load %arg3[%c0_5, %c0_6] : memref<1x4xf32, #tpu.memory_space<vmem>>, vector<1x4xf32>
    %cst = arith.constant dense<0.000000e+00> : vector<64x4xf32>
    %4 = tpu.matmul %1, %2, %cst {dimension_numbers = #tpu.dot_dimension_numbers<[1], [0], [0], [1], [0, 0, 1, 1], [], []>} : vector<64x32xf32>, vector<32x4xf32>, vector<64x4xf32> -> vector<64x4xf32>
    %5 = vector.broadcast %3 : vector<1x4xf32> to vector<64x4xf32>
    %6 = arith.addf %4, %5 : vector<64x4xf32>
    %7 = vector.shape_cast %6 : vector<64x4xf32> to vector<2x4x8x4xf32>
    %cst_7 = arith.constant dense<0.000000e+00> : vector<2x4x8xf32>
    %8 = vector.multi_reduction <add>, %7, %cst_7 [3] : vector<2x4x8x4xf32> to vector<2x4x8xf32>
    %9 = vector.shape_cast %8 : vector<2x4x8xf32> to vector<2x4x8x1xf32>
    %cst_8 = arith.constant dense<0.000000e+00> : vector<2x4x1xf32>
    %10 = vector.multi_reduction <add>, %9, %cst_8 [2] : vector<2x4x8x1xf32> to vector<2x4x1xf32>
    %11 = vector.shape_cast %10 : vector<2x4x1xf32> to vector<2x4x1x1xf32>
    %cst_9 = arith.constant dense<0.000000e+00> : vector<4x1x1xf32>
    %12 = vector.multi_reduction <add>, %11, %cst_9 [0] : vector<2x4x1x1xf32> to vector<4x1x1xf32>
    %13 = vector.shape_cast %12 : vector<4x1x1xf32> to vector<1x4x1x1xf32>
    %14 = arith.mulf %7, %7 : vector<2x4x8x4xf32>
    %cst_10 = arith.constant dense<0.000000e+00> : vector<2x4x8xf32>
    %15 = vector.multi_reduction <add>, %14, %cst_10 [3] : vector<2x4x8x4xf32> to vector<2x4x8xf32>
    %16 = vector.shape_cast %15 : vector<2x4x8xf32> to vector<2x4x8x1xf32>
    %cst_11 = arith.constant dense<0.000000e+00> : vector<2x4x1xf32>
    %17 = vector.multi_reduction <add>, %16, %cst_11 [2] : vector<2x4x8x1xf32> to vector<2x4x1xf32>
    %18 = vector.shape_cast %17 : vector<2x4x1xf32> to vector<2x4x1x1xf32>
    %cst_12 = arith.constant dense<0.000000e+00> : vector<4x1x1xf32>
    %19 = vector.multi_reduction <add>, %18, %cst_12 [0] : vector<2x4x1x1xf32> to vector<4x1x1xf32>
    %20 = vector.shape_cast %19 : vector<4x1x1xf32> to vector<1x4x1x1xf32>
    %cst_13 = arith.constant 1.562500e-02 : f32
    %21 = vector.broadcast %cst_13 : f32 to vector<1x4x1x1xf32>
    %22 = arith.mulf %13, %21 : vector<1x4x1x1xf32>
    %cst_14 = arith.constant 1.562500e-02 : f32
    %23 = vector.broadcast %cst_14 : f32 to vector<1x4x1x1xf32>
    %24 = arith.mulf %20, %23 : vector<1x4x1x1xf32>
    %25 = arith.mulf %22, %22 : vector<1x4x1x1xf32>
    %26 = arith.subf %24, %25 : vector<1x4x1x1xf32>
    %c0_15 = arith.constant 0 : index
    %c0_16 = arith.constant 0 : index
    %c0_17 = arith.constant 0 : index
    %c0_18 = arith.constant 0 : index
    %27 = vector.load %arg6[%c0_15, %c0_16, %c0_17, %c0_18] : memref<2x4x1x4xf32, #tpu.memory_space<vmem>>, vector<1x4x1x4xf32>
    %28 = vector.shape_cast %27 : vector<1x4x1x4xf32> to vector<4x1x4xf32>
    %c0_19 = arith.constant 0 : index
    %c0_20 = arith.constant 0 : index
    %c0_21 = arith.constant 0 : index
    %c0_22 = arith.constant 0 : index
    %29 = vector.load %arg7[%c0_19, %c0_20, %c0_21, %c0_22] : memref<2x4x1x4xf32, #tpu.memory_space<vmem>>, vector<1x4x1x4xf32>
    %30 = vector.shape_cast %29 : vector<1x4x1x4xf32> to vector<4x1x4xf32>
    %cst_23 = arith.constant 9.99999974E-6 : f32
    %31 = vector.broadcast %cst_23 : f32 to vector<1x4x1x1xf32>
    %32 = arith.addf %26, %31 : vector<1x4x1x1xf32>
    %33 = math.rsqrt %32 : vector<1x4x1x1xf32>
    %34 = vector.shape_cast %28 : vector<4x1x4xf32> to vector<1x4x1x4xf32>
    %35 = vector.broadcast %33 : vector<1x4x1x1xf32> to vector<1x4x1x4xf32>
    %36 = arith.mulf %35, %34 : vector<1x4x1x4xf32>
    %37 = vector.broadcast %22 : vector<1x4x1x1xf32> to vector<2x4x8x4xf32>
    %38 = arith.subf %7, %37 : vector<2x4x8x4xf32>
    %39 = vector.broadcast %36 : vector<1x4x1x4xf32> to vector<2x4x8x4xf32>
    %40 = arith.mulf %38, %39 : vector<2x4x8x4xf32>
    %41 = vector.shape_cast %30 : vector<4x1x4xf32> to vector<1x4x1x4xf32>
    %42 = vector.broadcast %41 : vector<1x4x1x4xf32> to vector<2x4x8x4xf32>
    %43 = arith.addf %40, %42 : vector<2x4x8x4xf32>
    %44 = vector.shape_cast %43 : vector<2x4x8x4xf32> to vector<64x4xf32>
    %cst_24 = arith.constant 0.000000e+00 : f32
    %45 = vector.broadcast %cst_24 : f32 to vector<64x4xf32>
    %46 = arith.maximumf %44, %45 : vector<64x4xf32>
    %c0_25 = arith.constant 0 : index
    %c0_26 = arith.constant 0 : index
    %47 = vector.load %arg4[%c0_25, %c0_26] : memref<4x4xf32, #tpu.memory_space<vmem>>, vector<4x4xf32>
    %c0_27 = arith.constant 0 : index
    %c0_28 = arith.constant 0 : index
    %48 = vector.load %arg5[%c0_27, %c0_28] : memref<1x4xf32, #tpu.memory_space<vmem>>, vector<1x4xf32>
    %cst_29 = arith.constant dense<0.000000e+00> : vector<64x4xf32>
    %49 = tpu.matmul %46, %47, %cst_29 {dimension_numbers = #tpu.dot_dimension_numbers<[1], [0], [0], [1], [0, 0, 1, 1], [], []>} : vector<64x4xf32>, vector<4x4xf32>, vector<64x4xf32> -> vector<64x4xf32>
    %50 = vector.broadcast %48 : vector<1x4xf32> to vector<64x4xf32>
    %51 = arith.addf %49, %50 : vector<64x4xf32>
    %52 = vector.shape_cast %51 : vector<64x4xf32> to vector<2x4x8x4xf32>
    %cst_30 = arith.constant dense<0.000000e+00> : vector<2x4x8xf32>
    %53 = vector.multi_reduction <add>, %52, %cst_30 [3] : vector<2x4x8x4xf32> to vector<2x4x8xf32>
    %54 = vector.shape_cast %53 : vector<2x4x8xf32> to vector<2x4x8x1xf32>
    %cst_31 = arith.constant dense<0.000000e+00> : vector<2x4x1xf32>
    %55 = vector.multi_reduction <add>, %54, %cst_31 [2] : vector<2x4x8x1xf32> to vector<2x4x1xf32>
    %56 = vector.shape_cast %55 : vector<2x4x1xf32> to vector<2x4x1x1xf32>
    %cst_32 = arith.constant dense<0.000000e+00> : vector<4x1x1xf32>
    %57 = vector.multi_reduction <add>, %56, %cst_32 [0] : vector<2x4x1x1xf32> to vector<4x1x1xf32>
    %58 = vector.shape_cast %57 : vector<4x1x1xf32> to vector<1x4x1x1xf32>
    %59 = arith.mulf %52, %52 : vector<2x4x8x4xf32>
    %cst_33 = arith.constant dense<0.000000e+00> : vector<2x4x8xf32>
    %60 = vector.multi_reduction <add>, %59, %cst_33 [3] : vector<2x4x8x4xf32> to vector<2x4x8xf32>
    %61 = vector.shape_cast %60 : vector<2x4x8xf32> to vector<2x4x8x1xf32>
    %cst_34 = arith.constant dense<0.000000e+00> : vector<2x4x1xf32>
    %62 = vector.multi_reduction <add>, %61, %cst_34 [2] : vector<2x4x8x1xf32> to vector<2x4x1xf32>
    %63 = vector.shape_cast %62 : vector<2x4x1xf32> to vector<2x4x1x1xf32>
    %cst_35 = arith.constant dense<0.000000e+00> : vector<4x1x1xf32>
    %64 = vector.multi_reduction <add>, %63, %cst_35 [0] : vector<2x4x1x1xf32> to vector<4x1x1xf32>
    %65 = vector.shape_cast %64 : vector<4x1x1xf32> to vector<1x4x1x1xf32>
    %cst_36 = arith.constant 1.562500e-02 : f32
    %66 = vector.broadcast %cst_36 : f32 to vector<1x4x1x1xf32>
    %67 = arith.mulf %58, %66 : vector<1x4x1x1xf32>
    %cst_37 = arith.constant 1.562500e-02 : f32
    %68 = vector.broadcast %cst_37 : f32 to vector<1x4x1x1xf32>
    %69 = arith.mulf %65, %68 : vector<1x4x1x1xf32>
    %70 = arith.mulf %67, %67 : vector<1x4x1x1xf32>
    %71 = arith.subf %69, %70 : vector<1x4x1x1xf32>
    %c1 = arith.constant 1 : index
    %c0_38 = arith.constant 0 : index
    %c0_39 = arith.constant 0 : index
    %c0_40 = arith.constant 0 : index
    %72 = vector.load %arg6[%c1, %c0_38, %c0_39, %c0_40] : memref<2x4x1x4xf32, #tpu.memory_space<vmem>>, vector<1x4x1x4xf32>
    %73 = vector.shape_cast %72 : vector<1x4x1x4xf32> to vector<4x1x4xf32>
    %c1_41 = arith.constant 1 : index
    %c0_42 = arith.constant 0 : index
    %c0_43 = arith.constant 0 : index
    %c0_44 = arith.constant 0 : index
    %74 = vector.load %arg7[%c1_41, %c0_42, %c0_43, %c0_44] : memref<2x4x1x4xf32, #tpu.memory_space<vmem>>, vector<1x4x1x4xf32>
    %75 = vector.shape_cast %74 : vector<1x4x1x4xf32> to vector<4x1x4xf32>
    %cst_45 = arith.constant 9.99999974E-6 : f32
    %76 = vector.broadcast %cst_45 : f32 to vector<1x4x1x1xf32>
    %77 = arith.addf %71, %76 : vector<1x4x1x1xf32>
    %78 = math.rsqrt %77 : vector<1x4x1x1xf32>
    %79 = vector.shape_cast %73 : vector<4x1x4xf32> to vector<1x4x1x4xf32>
    %80 = vector.broadcast %78 : vector<1x4x1x1xf32> to vector<1x4x1x4xf32>
    %81 = arith.mulf %80, %79 : vector<1x4x1x4xf32>
    %82 = vector.broadcast %67 : vector<1x4x1x1xf32> to vector<2x4x8x4xf32>
    %83 = arith.subf %52, %82 : vector<2x4x8x4xf32>
    %84 = vector.broadcast %81 : vector<1x4x1x4xf32> to vector<2x4x8x4xf32>
    %85 = arith.mulf %83, %84 : vector<2x4x8x4xf32>
    %86 = vector.shape_cast %75 : vector<4x1x4xf32> to vector<1x4x1x4xf32>
    %87 = vector.broadcast %86 : vector<1x4x1x4xf32> to vector<2x4x8x4xf32>
    %88 = arith.addf %85, %87 : vector<2x4x8x4xf32>
    %89 = vector.shape_cast %88 : vector<2x4x8x4xf32> to vector<64x4xf32>
    %90 = vector.shape_cast %89 : vector<64x4xf32> to vector<2x4x8x4xf32>
    %c0_46 = arith.constant 0 : index
    %c0_47 = arith.constant 0 : index
    %c0_48 = arith.constant 0 : index
    %c0_49 = arith.constant 0 : index
    %91 = vector.load %arg8[%c0_46, %c0_47, %c0_48, %c0_49] : memref<2x4x8x4xf32, #tpu.memory_space<vmem>>, vector<2x4x8x4xf32>
    tpu.vector_store %arg8[%c0_46, %c0_47, %c0_48, %c0_49], %90 {strides = array<i32>} : memref<2x4x8x4xf32, #tpu.memory_space<vmem>>, vector<2x4x8x4xf32>,
    return
  }
  func.func @transform_0(%arg0: i32) -> (i32, i32, i32, i32) {
    %c0_i32 = arith.constant 0 : i32
    %c0_i32_0 = arith.constant 0 : i32
    %c0_i32_1 = arith.constant 0 : i32
    %c0_i32_2 = arith.constant 0 : i32
    return %c0_i32, %arg0, %c0_i32_0, %c0_i32_1 : i32, i32, i32, i32
  }
  func.func @transform_1(%arg0: i32) -> (i32, i32) {
    %c0_i32 = arith.constant 0 : i32
    %c0_i32_0 = arith.constant 0 : i32
    %c0_i32_1 = arith.constant 0 : i32
    return %c0_i32, %c0_i32_0 : i32, i32
  }
  func.func @transform_2(%arg0: i32) -> (i32, i32) {
    %c0_i32 = arith.constant 0 : i32
    %c0_i32_0 = arith.constant 0 : i32
    %c0_i32_1 = arith.constant 0 : i32
    return %c0_i32, %c0_i32_0 : i32, i32
  }
  func.func @transform_3(%arg0: i32) -> (i32, i32) {
    %c0_i32 = arith.constant 0 : i32
    %c0_i32_0 = arith.constant 0 : i32
    %c0_i32_1 = arith.constant 0 : i32
    return %c0_i32, %c0_i32_0 : i32, i32
  }
  func.func @transform_4(%arg0: i32) -> (i32, i32) {
    %c0_i32 = arith.constant 0 : i32
    %c0_i32_0 = arith.constant 0 : i32
    %c0_i32_1 = arith.constant 0 : i32
    return %c0_i32, %c0_i32_0 : i32, i32
  }
  func.func @transform_5(%arg0: i32) -> (i32, i32, i32, i32) {
    %c0_i32 = arith.constant 0 : i32
    %c0_i32_0 = arith.constant 0 : i32
    %c0_i32_1 = arith.constant 0 : i32
    %c0_i32_2 = arith.constant 0 : i32
    return %c0_i32, %arg0, %c0_i32_0, %c0_i32_1 : i32, i32, i32, i32
  }
  func.func @transform_6(%arg0: i32) -> (i32, i32, i32, i32) {
    %c0_i32 = arith.constant 0 : i32
    %c0_i32_0 = arith.constant 0 : i32
    %c0_i32_1 = arith.constant 0 : i32
    %c0_i32_2 = arith.constant 0 : i32
    return %c0_i32, %arg0, %c0_i32_0, %c0_i32_1 : i32, i32, i32, i32
  }
  func.func @transform_7(%arg0: i32) -> (i32, i32, i32, i32) {
    %c0_i32 = arith.constant 0 : i32
    %c0_i32_0 = arith.constant 0 : i32
    %c0_i32_1 = arith.constant 0 : i32
    %c0_i32_2 = arith.constant 0 : i32
    return %c0_i32, %arg0, %c0_i32_0, %c0_i32_1 : i32, i32, i32, i32
  }
}

</mosaic_0001>

<bundles_post_ra>
// kernel: tpu_custom_call.1
= control target key start
LH: loop header
LB: loop body
LE: loop exit
PB: predicated region body
PF: predicated region fallthrough
CT: control target
= control target key end

     0   :  { %12 = vsyncpa [#allocation3], 0  ;;  %s1031_s24 = smov [#allocation2]   ;;  %s1377_s0 = inlined_call_operand.hbm [shape: f32[2,4,8,32], index: 0, kind: input, shape index: {}]   ;;  %s1378_s1 = inlined_call_operand.vmem [shape: f32[32,4], index: 1, kind: input, shape index: {}]   ;;  %s1379_s2 = inlined_call_operand.vmem [shape: f32[1,4], index: 2, kind: input, shape index: {}]   ;;  %s1380_s3 = inlined_call_operand.vmem [shape: f32[4,4], index: 3, kind: input, shape index: {}]   ;;  %s1381_s4 = inlined_call_operand.vmem [shape: f32[1,4], index: 4, kind: input, shape index: {}]   ;;  %s1382_s5 = inlined_call_operand.vmem [shape: f32[2,4,1,4], index: 5, kind: input, shape index: {}]   ;;  %s1383_s6 = inlined_call_operand.vmem [shape: f32[2,4,1,4], index: 6, kind: input, shape index: {}]   ;;  %s1384_s7 = inlined_call_operand.vmem [shape: f32[2,4,8,4], index: 7, kind: output, shape index: {}]  }
   0x1   :  { %s18_s25 = sshll.u32 %s1031_s24, 4  ;;  %s1007_s28 = scalar_lea.hbm %s1377_s0, 1024  ;;  %s19_s25 = int_to_ptr.vmem [resolvable:$true] %s18_s25 }
   0x2   :  { %p1008_p0 = scmp.ne.s32.totalorder %s1377_s0, %s1007_s28  ;;  %p1011_p1 = scmp.lt.u32.totalorder %s1007_s28, %s1377_s0 }
   0x4   :  { %p1013_p2 = pnand %p1011_p1, %p1008_p0 }
   0x6   :  { %1016 = shalt.err (!%p1013_p2)
}
   0x7   :  { %s1017_s10 = scalar_lea.vmem %s19_s25, 1024  ;;  %p1022_p4 = scmp.lt.s32.totalorder %s19_s25, %s19_s25 }
   0x8   :  { %p1018_p3 = scmp.ne.s32.totalorder %s19_s25, %s1017_s10  ;;  %p1023_p5 = scmp.lt.s32.totalorder %s1017_s10, %s1017_s10 }
   0xa   :  { %p1024_p6 = por %p1023_p5, %p1022_p4 }
   0xc   :  { %p1025_p7 = pnand %p1024_p6, %p1018_p3 }
   0xe   :  { %1028 = shalt.err (!%p1025_p7)
}
   0xf   :  { %s1032_s11 = smov 128   ;;  %s1033_s12 = smov 8  }
  0x10   :  { %24 = dma.hbm_to_vmem [thread:$0]  %s1377_s0, 1024, %s19_s25, [#allocation3], %s1032_s11, %s1032_s11, %s1033_s12  }
  0x11   :  { %1029 = dma.done.wait [#allocation3], 1024  }
  0x12   :  { %1030 = vsyncadd [#allocation3], 4294966272  ;;  %vm59_vm0 = vcmask 261120   ;;  %v48_v0 = vld [vmem:[%s1378_s1] sm:$0xff]  ;;  %v49_v1 = vld [vmem:[%s1378_s1 + $0x8] sm:$0xff]  ;;  %vm189_vm1 = vcmask 31744  }
  0x13   :  { %v50_v2 = vld [vmem:[%s1378_s1 + $0x10] sm:$0xff]  ;;  %v980_v3 = vpack.c.bf16 %v49_v1, %v48_v0  ;;  %v51_v4 = vld [vmem:[%s1378_s1 + $0x18] sm:$0xff]  ;;  %v40_v5 = vld [vmem:[#allocation2] sm:$0xff]  ;;  %vm498_vm2 = vcmask 1043456  }
  0x14   :  { %v984_v6 = vpack.c.bf16 %v51_v4, %v50_v2  ;;  %954 = vmatprep.mubr.msk.f32.mxu0 %vm59_vm0, %v40_v5  ;;  %v41_v7 = vld [vmem:[#allocation2 + $0x8] sm:$0xff]  ;;  %v42_v8 = vld [vmem:[#allocation2 + $0x10] sm:$0xff]  ;;  %v43_v9 = vld [vmem:[#allocation2 + $0x18] sm:$0xff] }
  0x15   :  { %981 = vmatprep.subr.bf16.mxu0 %v980_v3  ;;  %v44_v10 = vld [vmem:[#allocation2 + $0x20] sm:$0xff]  ;;  %v45_v11 = vld [vmem:[#allocation2 + $0x28] sm:$0xff]  ;;  %v46_v12 = vld [vmem:[#allocation2 + $0x30] sm:$0xff] }
  0x16   :  { %983 = vmatpush3.bf16.msra.mxu0 %v980_v3  ;;  %v47_v13 = vld [vmem:[#allocation2 + $0x38] sm:$0xff]  ;;  %v890_v14 = vld [vmem:[%s1379_s2] ss:$0 sm:$0xff] }
  0x17   :  { %985 = vmatprep.subr.bf16.mxu0 %v984_v6  ;;  %v466_v55 = vld [vmem:[%s1380_s3] sm:$0xf] }
  0x18   :  { %966 = vmatprep.subr.msk.mxu1 %vm498_vm2, %v466_v55 }
  0x19   :  { %967 = vmatpush3.msk.msra.mxu1 %vm498_vm2, %v466_v55 }
  0x1a   :  { %987 = vmatpush3.bf16.msra.mxu0 %v984_v6 }
  0x1d   :  { %955 = vmatmul.mubr.msk.f32.vlgmr.msra.gmra.mrb[0].mxu0 %vm59_vm0, %v41_v7 }
  0x1e   :  { %957 = vmatprep.mubr.msk.f32.mxu0 %vm59_vm0, %v42_v8 }
  0x21   :  { %958 = vmatmul.mubr.msk.f32.gmra.mrb[2].mxu0 %vm59_vm0, %v43_v9 }
  0x22   :  { %960 = vmatprep.mubr.msk.f32.mxu0 %vm59_vm0, %v44_v10 }
  0x25   :  { %961 = vmatmul.mubr.msk.f32.gmra.mrb[4].mxu0 %vm59_vm0, %v45_v11 }
  0x26   :  { %963 = vmatprep.mubr.msk.f32.mxu0 %vm59_vm0, %v46_v12 }
  0x29   :  { %964 = vmatmul.mubr.msk.f32.gmra.mrb[6].mxu0 %vm59_vm0, %v47_v13 }
  0xf0   :  { %v956_v15 = vpop.f32.mrb[0].mxu0 }
  0xf1   :  { %v1109_v16 = vadd.f32 %v956_v15, %v890_v14  ;;  %v150_v17 = vpop.f32.mrb[1].mxu0 }
  0xf2   :  { %v1111_v18 = vadd.f32 %v890_v14, %v150_v17 }
  0xf3   :  { %v193_v19 = vsel %vm189_vm1, %v1109_v16, 0.0  ;;  %v267_v22 = vmul.f32 %v1109_v16, %v1109_v16 }
  0xf4   :  { %194 = vadd.xlane.f32.xlu1 %v193_v19  ;;  %v959_v20 = vpop.f32.mrb[2].mxu0  ;;  %v190_v21 = vsel %vm189_vm1, %v1111_v18, 0.0  ;;  %v266_v26 = vmul.f32 %v1111_v18, %v1111_v18 }
  0xf5   :  { %v160_v23 = vpop.f32.mrb[3].mxu0  ;;  %191 = vadd.xlane.f32.xlu0 %v190_v21  ;;  %v277_v25 = vsel %vm189_vm1, %v267_v22, 0.0  ;;  %v1130_v32 = vadd.f32 %v959_v20, %v890_v14 }
  0xf6   :  { %v274_v33 = vsel %vm189_vm1, %v266_v26, 0.0  ;;  %v1136_v38 = vadd.f32 %v890_v14, %v160_v23 }
  0xf7   :  { %v199_v39 = vsel %vm189_vm1, %v1130_v32, 0.0  ;;  %v269_v50 = vmul.f32 %v1130_v32, %v1130_v32 }
  0xf8   :  { %v962_v24 = vpop.f32.mrb[4].mxu0  ;;  %v196_v42 = vsel %vm189_vm1, %v1136_v38, 0.0  ;;  %v268_v46 = vmul.f32 %v1136_v38, %v1136_v38 }
  0xf9   :  { %v1122_v27 = vadd.f32 %v962_v24, %v890_v14  ;;  %v170_v28 = vpop.f32.mrb[5].mxu0  ;;  %278 = vadd.xlane.f32.xlu0 %v277_v25  ;;  %v283_v53 = vsel %vm189_vm1, %v269_v50, 0.0 }
  0xfa   :  { %v1124_v29 = vadd.f32 %v890_v14, %v170_v28  ;;  %v280_v49 = vsel %vm189_vm1, %v268_v46, 0.0 }
  0xfb   :  { %v205_v30 = vsel %vm189_vm1, %v1122_v27, 0.0  ;;  %v271_v31 = vmul.f32 %v1122_v27, %v1122_v27 }
  0xfc   :  { %206 = vadd.xlane.f32.xlu1 %v205_v30  ;;  %v965_v34 = vpop.f32.mrb[6].mxu0  ;;  %v270_v37 = vmul.f32 %v1124_v29, %v1124_v29  ;;  %v202_v45 = vsel %vm189_vm1, %v1124_v29, 0.0 }
  0xfd   :  { %275 = vadd.xlane.f32.xlu0 %v274_v33  ;;  %v180_v35 = vpop.f32.mrb[7].mxu0  ;;  %v289_v36 = vsel %vm189_vm1, %v271_v31, 0.0  ;;  %v1140_v40 = vadd.f32 %v965_v34, %v890_v14 }
  0xfe   :  { %v286_v41 = vsel %vm189_vm1, %v270_v37, 0.0  ;;  %v1147_v44 = vadd.f32 %v890_v14, %v180_v35 }
  0xff   :  { %v211_v43 = vsel %vm189_vm1, %v1140_v40, 0.0  ;;  %v273_v52 = vmul.f32 %v1140_v40, %v1140_v40 }
 0x100   :  { %290 = vadd.xlane.f32.xlu1 %v289_v36  ;;  %v208_v47 = vsel %vm189_vm1, %v1147_v44, 0.0  ;;  %v272_v48 = vmul.f32 %v1147_v44, %v1147_v44 }
 0x101   :  { %200 = vadd.xlane.f32.xlu0 %v199_v39  ;;  %v295_v54 = vsel %vm189_vm1, %v273_v52, 0.0 }
 0x102   :  { %v292_v51 = vsel %vm189_vm1, %v272_v48, 0.0 }
 0x104   :  { %287 = vadd.xlane.f32.xlu1 %v286_v41 }
 0x105   :  { %197 = vadd.xlane.f32.xlu0 %v196_v42 }
 0x108   :  { %212 = vadd.xlane.f32.xlu1 %v211_v43 }
 0x109   :  { %203 = vadd.xlane.f32.xlu0 %v202_v45 }
 0x10c   :  { %209 = vadd.xlane.f32.xlu1 %v208_v47 }
 0x10d   :  { %281 = vadd.xlane.f32.xlu0 %v280_v49 }
 0x110   :  { %293 = vadd.xlane.f32.xlu1 %v292_v51 }
 0x111   :  { %284 = vadd.xlane.f32.xlu0 %v283_v53 }
 0x114   :  { %296 = vadd.xlane.f32.xlu1 %v295_v54 }
 0x181   :  { %v195_v56 = vpop.xlane.xlu1 %194 }
 0x182   :  { %v220_v57 = vrot.slane %v195_v56, 4  ;;  %v192_v58 = vpop.xlane.xlu0 %191 }
 0x183   :  { %v214_v60 = vrot.slane %v192_v58, 4 }
 0x184   :  { %v221_v59 = vadd.f32 %v220_v57, %v195_v56 }
 0x185   :  { %v215_v0 = vadd.f32 %v214_v60, %v192_v58 }
 0x186   :  { %v279_v61 = vpop.xlane.xlu0 %278  ;;  %v222_v63 = vrot.slane %v221_v59, 2 }
 0x187   :  { %v304_v62 = vrot.slane %v279_v61, 4  ;;  %v216_v9 = vrot.slane %v215_v0, 2 }
 0x188   :  { %v223_v7 = vadd.f32 %v222_v63, %v221_v59 }
 0x189   :  { %v305_v1 = vadd.f32 %v304_v62, %v279_v61  ;;  %v207_v2 = vpop.xlane.xlu1 %206  ;;  %v217_v22 = vadd.f32 %v216_v9, %v215_v0 }
 0x18a   :  { %v244_v3 = vrot.slane %v207_v2, 4  ;;  %v276_v4 = vpop.xlane.xlu0 %275  ;;  %v224_v19 = vrot.slane %v223_v7, 1 }
 0x18b   :  { %v306_v5 = vrot.slane %v305_v1, 2  ;;  %v298_v6 = vrot.slane %v276_v4, 4  ;;  %v218_v41 = vrot.slane %v217_v22, 1 }
 0x18c   :  { %v245_v8 = vadd.f32 %v244_v3, %v207_v2  ;;  %v225_v35 = vadd.f32 %v224_v19, %v223_v7 }
 0x18d   :  { %v291_v10 = vpop.xlane.xlu1 %290  ;;  %v307_v14 = vadd.f32 %v306_v5, %v305_v1  ;;  %v299_v15 = vadd.f32 %v298_v6, %v276_v4  ;;  %v219_v62 = vadd.f32 %v218_v41, %v217_v22 }
 0x18e   :  { %v246_v11 = vrot.slane %v245_v8, 2  ;;  %v328_v12 = vrot.slane %v291_v10, 4  ;;  %v201_v13 = vpop.xlane.xlu0 %200 }
 0x18f   :  { %v232_v17 = vrot.slane %v201_v13, 4  ;;  %v308_v31 = vrot.slane %v307_v14, 1  ;;  %v300_v33 = vrot.slane %v299_v15, 2 }
 0x190   :  { %v247_v20 = vadd.f32 %v246_v11, %v245_v8  ;;  %v329_v21 = vadd.f32 %v328_v12, %v291_v10 }
 0x191   :  { %v233_v23 = vadd.f32 %v232_v17, %v201_v13  ;;  %v288_v24 = vpop.xlane.xlu1 %287  ;;  %v309_v51 = vadd.f32 %v308_v31, %v307_v14  ;;  %v301_v52 = vadd.f32 %v300_v33, %v299_v15 }
 0x192   :  { %v248_v25 = vrot.slane %v247_v20, 1  ;;  %v330_v26 = vrot.slane %v329_v21, 2  ;;  %v322_v28 = vrot.slane %v288_v24, 4  ;;  %v198_v30 = vpop.xlane.xlu0 %197 }
 0x193   :  { %v226_v34 = vrot.slane %v198_v30, 4  ;;  %v234_v42 = vrot.slane %v233_v23, 2  ;;  %v302_v3 = vrot.slane %v301_v52, 1 }
 0x194   :  { %v249_v36 = vadd.f32 %v248_v25, %v247_v20  ;;  %v331_v37 = vadd.f32 %v330_v26, %v329_v21  ;;  %v323_v39 = vadd.f32 %v322_v28, %v288_v24 }
 0x195   :  { %v227_v43 = vadd.f32 %v226_v34, %v198_v30  ;;  %v213_v45 = vpop.xlane.xlu1 %212  ;;  %v235_v59 = vadd.f32 %v234_v42, %v233_v23  ;;  %v303_v28 = vadd.f32 %v302_v3, %v301_v52 }
 0x196   :  { %v263_v46 = vadd.f32 %v249_v36, %v225_v35  ;;  %v332_v47 = vrot.slane %v331_v37, 1  ;;  %v324_v48 = vrot.slane %v323_v39, 2  ;;  %v256_v49 = vrot.slane %v213_v45, 4  ;;  %v204_v50 = vpop.xlane.xlu0 %203 }
 0x197   :  { %v228_v53 = vrot.slane %v227_v43, 2  ;;  %v238_v54 = vrot.slane %v204_v50, 4  ;;  %v236_v11 = vrot.slane %v235_v59, 1 }
 0x198   :  { %v1168_v55 = vmul.f32 0.015625, %v263_v46  ;;  %v333_v56 = vadd.f32 %v332_v47, %v331_v37  ;;  %v325_v57 = vadd.f32 %v324_v48, %v323_v39  ;;  %v257_v58 = vadd.f32 %v256_v49, %v213_v45 }
 0x199   :  { %v239_v60 = vadd.f32 %v238_v54, %v204_v50  ;;  %v210_v61 = vpop.xlane.xlu1 %209  ;;  %v229_v9 = vadd.f32 %v228_v53, %v227_v43  ;;  %v237_v41 = vadd.f32 %v236_v11, %v235_v59 }
 0x19a   :  { %v347_v63 = vadd.f32 %v333_v56, %v309_v51  ;;  %v326_v0 = vrot.slane %v325_v57, 1  ;;  %v258_v1 = vrot.slane %v257_v58, 2  ;;  %v282_v2 = vpop.xlane.xlu0 %281  ;;  %v250_v5 = vrot.slane %v210_v61, 4 }
 0x19b   :  { %v240_v4 = vrot.slane %v239_v60, 2  ;;  %v310_v6 = vrot.slane %v282_v2, 4  ;;  %v359_v7 = vmul.f32 %v1168_v55, %v1168_v55  ;;  %v230_v31 = vrot.slane %v229_v9, 1 }
 0x19c   :  { %v355_v8 = vmul.f32 0.015625, %v347_v63  ;;  %v259_v10 = vadd.f32 %v258_v1, %v257_v58  ;;  %v251_v13 = vadd.f32 %v250_v5, %v210_v61  ;;  %v327_v19 = vadd.f32 %v326_v0, %v325_v57 }
 0x19d   :  { %v241_v12 = vadd.f32 %v240_v4, %v239_v60  ;;  %v311_v14 = vadd.f32 %v310_v6, %v282_v2  ;;  %v294_v15 = vpop.xlane.xlu1 %293  ;;  %v231_v53 = vadd.f32 %v230_v31, %v229_v9  ;;  %v398_v6 = vlaneseq  ;;  %v366_v31 = vld [vmem:[%s1382_s5] sm:$0x1] }
 0x19e   :  { %v363_v17 = vsub.f32 %v355_v8, %v359_v7  ;;  %v260_v20 = vrot.slane %v259_v10, 1  ;;  %v334_v21 = vrot.slane %v294_v15, 4  ;;  %v285_v22 = vpop.xlane.xlu0 %284  ;;  %v252_v24 = vrot.slane %v251_v13, 2 }
 0x19f   :  { %v242_v23 = vrot.slane %v241_v12, 1  ;;  %v312_v25 = vrot.slane %v311_v14, 2  ;;  %v316_v26 = vrot.slane %v285_v22, 4  ;;  %v346_v42 = vadd.f32 %v327_v19, %v303_v28 }
 0x1a0   :  { %v375_v30 = vadd.f32 1e-05, %v363_v17  ;;  %v335_v33 = vadd.f32 %v334_v21, %v294_v15  ;;  %v253_v35 = vadd.f32 %v252_v24, %v251_v13  ;;  %v261_v46 = vadd.f32 %v260_v20, %v259_v10  ;;  %v367_v21 = vld [vmem:[%s1382_s5 + $0x1] sm:$0x1] }
 0x1a1   :  { %v243_v34 = vadd.f32 %v242_v23, %v241_v12  ;;  %v313_v36 = vadd.f32 %v312_v25, %v311_v14  ;;  %v317_v37 = vadd.f32 %v316_v26, %v285_v22  ;;  %v297_v39 = vpop.xlane.xlu1 %296  ;;  %v354_v61 = vmul.f32 0.015625, %v346_v42  ;;  %v900_v42 = vld [vmem:[%s1383_s6 + $0x1] ss:$0 sm:$0xff] }
 0x1a2   :  { %v336_v43 = vrot.slane %v335_v33, 2  ;;  %v340_v45 = vrot.slane %v297_v39, 4  ;;  %v254_v48 = vrot.slane %v253_v35, 1  ;;  %991 = vrsqrt.f32 %v375_v30 }
 0x1a3   :  { %v262_v47 = vadd.f32 %v243_v34, %v219_v62  ;;  %v318_v49 = vrot.slane %v317_v37, 2  ;;  %v314_v50 = vrot.slane %v313_v36, 1  ;;  %v265_v59 = vadd.f32 %v261_v46, %v237_v41 }
 0x1a4   :  { %v337_v51 = vadd.f32 %v336_v43, %v335_v33  ;;  %v341_v52 = vadd.f32 %v340_v45, %v297_v39  ;;  %v255_v56 = vadd.f32 %v254_v48, %v253_v35  ;;  %v399_v15 = vshrl.u32 %v398_v6, 7  ;;  %v368_v43 = vld [vmem:[%s1382_s5 + $0x2] sm:$0x1]  ;;  %v899_v45 = vld [vmem:[%s1383_s6] ss:$0 sm:$0xff] }
 0x1a5   :  { %v1172_v54 = vmul.f32 0.015625, %v262_v47  ;;  %v319_v57 = vadd.f32 %v318_v49, %v317_v37  ;;  %v315_v62 = vadd.f32 %v314_v50, %v313_v36  ;;  %v1178_v9 = vmul.f32 0.015625, %v265_v59 }
 0x1a6   :  { %v338_v58 = vrot.slane %v337_v51, 1  ;;  %v342_v60 = vrot.slane %v341_v52, 2  ;;  %v264_v0 = vadd.f32 %v255_v56, %v231_v53  ;;  %v1187_v25 = vsub.s32 0, %v399_v15 }
 0x1a7   :  { %v358_v63 = vmul.f32 %v1172_v54, %v1172_v54  ;;  %v320_v2 = vrot.slane %v319_v57, 1  ;;  %v361_v24 = vmul.f32 %v1178_v9, %v1178_v9  ;;  %v387_v35 = vsub.f32 %v1109_v16, %v1168_v55 }
 0x1a8   :  { %v339_v1 = vadd.f32 %v338_v58, %v337_v51  ;;  %v343_v3 = vadd.f32 %v342_v60, %v341_v52  ;;  %v1176_v5 = vmul.f32 0.015625, %v264_v0  ;;  %v386_v39 = vsub.f32 %v1111_v18, %v1172_v54  ;;  %v369_v18 = vld [vmem:[%s1382_s5 + $0x3] sm:$0x1] }
 0x1a9   :  { %v362_v4 = vsub.f32 %v354_v61, %v358_v63  ;;  %v321_v13 = vadd.f32 %v320_v2, %v319_v57  ;;  %v390_v53 = vsub.f32 %v1124_v29, %v1172_v54  ;;  %v901_v57 = vld [vmem:[%s1383_s6 + $0x2] ss:$0 sm:$0xff]  ;;  %v389_v63 = vsub.f32 %v1130_v32, %v1178_v9  ;;  %v902_v54 = vld [vmem:[%s1383_s6 + $0x3] ss:$0 sm:$0xff] }
 0x1aa   :  { %v348_v7 = vadd.f32 %v339_v1, %v315_v62  ;;  %v344_v8 = vrot.slane %v343_v3, 1  ;;  %v360_v12 = vmul.f32 %v1176_v5, %v1176_v5  ;;  %v388_v50 = vsub.f32 %v1136_v38, %v1176_v5 }
 0x1ab   :  { %v374_v10 = vadd.f32 1e-05, %v362_v4  ;;  %v391_v29 = vsub.f32 %v1122_v27, %v1168_v55  ;;  %v392_v62 = vsub.f32 %v1147_v44, %v1176_v5 }
 0x1ac   :  { %v356_v11 = vmul.f32 0.015625, %v348_v7  ;;  %v345_v14 = vadd.f32 %v344_v8, %v343_v3  ;;  %v992_v17 = vpop.eup %991  ;;  %v393_v7 = vsub.f32 %v1140_v40, %v1178_v9  ;;  %v903_v40 = vld [vmem:[%s1381_s4] ss:$0 sm:$0xff] }
 0x1ad   :  { %993 = vrsqrt.f32 %v374_v10  ;;  %v383_v26 = vmul.f32 %v992_v17, %v367_v21 }
 0x1ae   :  { %v364_v19 = vsub.f32 %v356_v11, %v360_v12  ;;  %v349_v20 = vadd.f32 %v345_v14, %v321_v13 }
 0x1af   :  { %v405_v33 = vrot.slane %v383_v26, %v1187_v25 }
 0x1b0   :  { %v376_v22 = vadd.f32 1e-05, %v364_v19  ;;  %v357_v23 = vmul.f32 0.015625, %v349_v20 }
 0x1b1   :  { %v419_v37 = vmul.f32 %v405_v33, %v387_v35  ;;  %v423_v3 = vmul.f32 %v405_v33, %v391_v29 }
 0x1b2   :  { %995 = vrsqrt.f32 %v376_v22  ;;  %v365_v28 = vsub.f32 %v357_v23, %v361_v24 }
 0x1b3   :  { %v451_v47 = vadd.f32 %v900_v42, %v419_v37  ;;  %v455_v27 = vadd.f32 %v900_v42, %v423_v3 }
 0x1b4   :  { %v377_v30 = vadd.f32 1e-05, %v365_v28 }
 0x1b5   :  { %v459_v58 = vmax.f32 %v451_v47, 0.0  ;;  %v463_v44 = vmax.f32 %v455_v27, 0.0 }
 0x1b6   :  { %997 = vrsqrt.f32 %v377_v30 }
 0x1b7   :  { %v994_v34 = vpop.eup %993 }
 0x1b8   :  { %v382_v36 = vmul.f32 %v994_v34, %v366_v31 }
 0x1ba   :  { %v401_v41 = vrot.slane %v382_v36, %v1187_v25 }
 0x1bc   :  { %v996_v16 = vpop.eup %995  ;;  %v418_v46 = vmul.f32 %v401_v41, %v386_v39  ;;  %v422_v59 = vmul.f32 %v401_v41, %v390_v53 }
 0x1bd   :  { %v384_v48 = vmul.f32 %v996_v16, %v368_v43 }
 0x1be   :  { %v450_v49 = vadd.f32 %v899_v45, %v418_v46  ;;  %v454_v4 = vadd.f32 %v899_v45, %v422_v59 }
 0x1bf   :  { %v409_v51 = vrot.slane %v384_v48, %v1187_v25 }
 0x1c0   :  { %v998_v52 = vpop.eup %997  ;;  %v458_v56 = vmax.f32 %v450_v49, 0.0  ;;  %v462_v10 = vmax.f32 %v454_v4, 0.0 }
 0x1c1   :  { %v420_v60 = vmul.f32 %v409_v51, %v388_v50  ;;  %v385_v61 = vmul.f32 %v998_v52, %v369_v18  ;;  %v424_v6 = vmul.f32 %v409_v51, %v392_v62 }
 0x1c2   :  { %968 = vmatprep.mubr.msk.f32.mxu1 %vm189_vm1, %v458_v56 }
 0x1c3   :  { %969 = vmatmul.mubr.msk.f32.vlgmr.msra.gmra.mrb[0].mxu1 %vm189_vm1, %v459_v58  ;;  %v452_v38 = vadd.f32 %v901_v57, %v420_v60  ;;  %v413_v0 = vrot.slane %v385_v61, %v1187_v25  ;;  %v456_v11 = vadd.f32 %v901_v57, %v424_v6 }
 0x1c5   :  { %v460_v1 = vmax.f32 %v452_v38, 0.0  ;;  %v421_v2 = vmul.f32 %v413_v0, %v389_v63  ;;  %v425_v55 = vmul.f32 %v413_v0, %v393_v7  ;;  %v464_v12 = vmax.f32 %v456_v11, 0.0 }
 0x1c7   :  { %971 = vmatprep.mubr.msk.f32.mxu1 %vm189_vm1, %v460_v1  ;;  %v453_v32 = vadd.f32 %v902_v54, %v421_v2  ;;  %v457_v5 = vadd.f32 %v902_v54, %v425_v55 }
 0x1c9   :  { %v461_v8 = vmax.f32 %v453_v32, 0.0  ;;  %v465_v13 = vmax.f32 %v457_v5, 0.0 }
 0x1cb   :  { %972 = vmatmul.mubr.msk.f32.gmra.mrb[2].mxu1 %vm189_vm1, %v461_v8 }
 0x1cc   :  { %974 = vmatprep.mubr.msk.f32.mxu1 %vm189_vm1, %v462_v10 }
 0x1cf   :  { %975 = vmatmul.mubr.msk.f32.gmra.mrb[4].mxu1 %vm189_vm1, %v463_v44 }
 0x1d0   :  { %977 = vmatprep.mubr.msk.f32.mxu1 %vm189_vm1, %v464_v12 }
 0x1d3   :  { %978 = vmatmul.mubr.msk.f32.gmra.mrb[6].mxu1 %vm189_vm1, %v465_v13 }
 0x296   :  { %v970_v9 = vpop.f32.mrb[0].mxu1 }
 0x297   :  { %v1241_v14 = vadd.f32 %v970_v9, %v903_v40  ;;  %v568_v15 = vpop.f32.mrb[1].mxu1 }
 0x298   :  { %v1243_v17 = vadd.f32 %v903_v40, %v568_v15 }
 0x299   :  { %v610_v19 = vsel %vm189_vm1, %v1241_v14, 0.0  ;;  %v684_v20 = vmul.f32 %v1241_v14, %v1241_v14 }
 0x29a   :  { %611 = vadd.xlane.f32.xlu1 %v610_v19  ;;  %v607_v21 = vsel %vm189_vm1, %v1243_v17, 0.0  ;;  %v683_v22 = vmul.f32 %v1243_v17, %v1243_v17 }
 0x29b   :  { %608 = vadd.xlane.f32.xlu0 %v607_v21  ;;  %v694_v23 = vsel %vm189_vm1, %v684_v20, 0.0 }
 0x29c   :  { %v691_v26 = vsel %vm189_vm1, %v683_v22, 0.0 }
 0x29e   :  { %695 = vadd.xlane.f32.xlu1 %v694_v23  ;;  %v973_v24 = vpop.f32.mrb[2].mxu1 }
 0x29f   :  { %v1255_v28 = vadd.f32 %v973_v24, %v903_v40  ;;  %692 = vadd.xlane.f32.xlu0 %v691_v26  ;;  %v578_v30 = vpop.f32.mrb[3].mxu1 }
 0x2a0   :  { %v1257_v31 = vadd.f32 %v903_v40, %v578_v30 }
 0x2a1   :  { %v616_v33 = vsel %vm189_vm1, %v1255_v28, 0.0  ;;  %v686_v34 = vmul.f32 %v1255_v28, %v1255_v28 }
 0x2a2   :  { %617 = vadd.xlane.f32.xlu1 %v616_v33  ;;  %v976_v35 = vpop.f32.mrb[4].mxu1  ;;  %v613_v36 = vsel %vm189_vm1, %v1257_v31, 0.0  ;;  %v685_v37 = vmul.f32 %v1257_v31, %v1257_v31 }
 0x2a3   :  { %v588_v39 = vpop.f32.mrb[5].mxu1  ;;  %614 = vadd.xlane.f32.xlu0 %v613_v36  ;;  %v1267_v41 = vadd.f32 %v976_v35, %v903_v40  ;;  %v700_v42 = vsel %vm189_vm1, %v686_v34, 0.0 }
 0x2a4   :  { %v1270_v43 = vadd.f32 %v903_v40, %v588_v39  ;;  %v697_v16 = vsel %vm189_vm1, %v685_v37, 0.0 }
 0x2a5   :  { %v622_v47 = vsel %vm189_vm1, %v1267_v41, 0.0  ;;  %v688_v48 = vmul.f32 %v1267_v41, %v1267_v41 }
 0x2a6   :  { %701 = vadd.xlane.f32.xlu1 %v700_v42  ;;  %v979_v45 = vpop.f32.mrb[6].mxu1  ;;  %v619_v49 = vsel %vm189_vm1, %v1270_v43, 0.0  ;;  %v687_v18 = vmul.f32 %v1270_v43, %v1270_v43 }
 0x2a7   :  { %v598_v46 = vpop.f32.mrb[7].mxu1  ;;  %698 = vadd.xlane.f32.xlu0 %v697_v16  ;;  %v1281_v50 = vadd.f32 %v979_v45, %v903_v40  ;;  %v706_v51 = vsel %vm189_vm1, %v688_v48, 0.0 }
 0x2a8   :  { %v1284_v52 = vadd.f32 %v903_v40, %v598_v46  ;;  %v703_v53 = vsel %vm189_vm1, %v687_v18, 0.0 }
 0x2a9   :  { %v628_v56 = vsel %vm189_vm1, %v1281_v50, 0.0  ;;  %v690_v57 = vmul.f32 %v1281_v50, %v1281_v50 }
 0x2aa   :  { %623 = vadd.xlane.f32.xlu1 %v622_v47  ;;  %v625_v58 = vsel %vm189_vm1, %v1284_v52, 0.0  ;;  %v689_v60 = vmul.f32 %v1284_v52, %v1284_v52 }
 0x2ab   :  { %620 = vadd.xlane.f32.xlu0 %v619_v49  ;;  %v712_v61 = vsel %vm189_vm1, %v690_v57, 0.0 }
 0x2ac   :  { %v709_v59 = vsel %vm189_vm1, %v689_v60, 0.0 }
 0x2ae   :  { %707 = vadd.xlane.f32.xlu1 %v706_v51 }
 0x2af   :  { %704 = vadd.xlane.f32.xlu0 %v703_v53 }
 0x2b2   :  { %629 = vadd.xlane.f32.xlu1 %v628_v56 }
 0x2b3   :  { %626 = vadd.xlane.f32.xlu0 %v625_v58 }
 0x2b6   :  { %713 = vadd.xlane.f32.xlu1 %v712_v61 }
 0x2b7   :  { %710 = vadd.xlane.f32.xlu0 %v709_v59 }
 0x327   :  { %v612_v38 = vpop.xlane.xlu1 %611 }
 0x328   :  { %v637_v63 = vrot.slane %v612_v38, 4  ;;  %v609_v0 = vpop.xlane.xlu0 %608 }
 0x329   :  { %v631_v29 = vrot.slane %v609_v0, 4 }
 0x32a   :  { %v638_v62 = vadd.f32 %v637_v63, %v612_v38 }
 0x32b   :  { %v696_v54 = vpop.xlane.xlu1 %695  ;;  %v632_v3 = vadd.f32 %v631_v29, %v609_v0 }
 0x32c   :  { %v721_v1 = vrot.slane %v696_v54, 4  ;;  %v693_v2 = vpop.xlane.xlu0 %692  ;;  %v639_v8 = vrot.slane %v638_v62, 2 }
 0x32d   :  { %v715_v4 = vrot.slane %v693_v2, 4  ;;  %v633_v10 = vrot.slane %v632_v3, 2 }
 0x32e   :  { %v722_v6 = vadd.f32 %v721_v1, %v696_v54  ;;  %v640_v13 = vadd.f32 %v639_v8, %v638_v62 }
 0x32f   :  { %v716_v32 = vadd.f32 %v715_v4, %v693_v2  ;;  %v618_v7 = vpop.xlane.xlu1 %617  ;;  %v634_v15 = vadd.f32 %v633_v10, %v632_v3 }
 0x330   :  { %v649_v27 = vrot.slane %v618_v7, 4  ;;  %v615_v55 = vpop.xlane.xlu0 %614  ;;  %v723_v44 = vrot.slane %v722_v6, 2  ;;  %v641_v26 = vrot.slane %v640_v13, 1 }
 0x331   :  { %v643_v11 = vrot.slane %v615_v55, 4  ;;  %v717_v5 = vrot.slane %v716_v32, 2  ;;  %v635_v35 = vrot.slane %v634_v15, 1 }
 0x332   :  { %v650_v40 = vadd.f32 %v649_v27, %v618_v7  ;;  %v724_v20 = vadd.f32 %v723_v44, %v722_v6  ;;  %v642_v49 = vadd.f32 %v641_v26, %v640_v13 }
 0x333   :  { %v702_v12 = vpop.xlane.xlu1 %701  ;;  %v644_v19 = vadd.f32 %v643_v11, %v615_v55  ;;  %v718_v22 = vadd.f32 %v717_v5, %v716_v32  ;;  %v636_v57 = vadd.f32 %v635_v35, %v634_v15 }
 0x334   :  { %v699_v9 = vpop.xlane.xlu0 %698  ;;  %v733_v21 = vrot.slane %v702_v12, 4  ;;  %v651_v30 = vrot.slane %v650_v40, 2  ;;  %v725_v39 = vrot.slane %v724_v20, 1 }
 0x335   :  { %v727_v23 = vrot.slane %v699_v9, 4  ;;  %v645_v36 = vrot.slane %v644_v19, 2  ;;  %v719_v16 = vrot.slane %v718_v22, 1 }
 0x336   :  { %v734_v42 = vadd.f32 %v733_v21, %v702_v12  ;;  %v652_v18 = vadd.f32 %v651_v30, %v650_v40  ;;  %v726_v59 = vadd.f32 %v725_v39, %v724_v20 }
 0x337   :  { %v624_v24 = vpop.xlane.xlu1 %623  ;;  %v728_v46 = vadd.f32 %v727_v23, %v699_v9  ;;  %v646_v58 = vadd.f32 %v645_v36, %v644_v19  ;;  %v720_v29 = vadd.f32 %v719_v16, %v718_v22 }
 0x338   :  { %v661_v33 = vrot.slane %v624_v24, 4  ;;  %v621_v34 = vpop.xlane.xlu0 %620  ;;  %v735_v38 = vrot.slane %v734_v42, 2  ;;  %v653_v3 = vrot.slane %v652_v18, 1 }
 0x339   :  { %v655_v37 = vrot.slane %v621_v34, 4  ;;  %v729_v54 = vrot.slane %v728_v46, 2  ;;  %v647_v8 = vrot.slane %v646_v58, 1 }
 0x33a   :  { %v662_v45 = vadd.f32 %v661_v33, %v624_v24  ;;  %v736_v11 = vadd.f32 %v735_v38, %v734_v42 }
 0x33b   :  { %v656_v47 = vadd.f32 %v655_v37, %v621_v34  ;;  %v708_v48 = vpop.xlane.xlu1 %707  ;;  %v730_v13 = vadd.f32 %v729_v54, %v728_v46 }
 0x33c   :  { %v663_v51 = vrot.slane %v662_v45, 2  ;;  %v745_v53 = vrot.slane %v708_v48, 4  ;;  %v705_v56 = vpop.xlane.xlu0 %704 }
 0x33d   :  { %v657_v60 = vrot.slane %v656_v47, 2  ;;  %v739_v61 = vrot.slane %v705_v56, 4 }
 0x33e   :  { %v664_v63 = vadd.f32 %v663_v51, %v662_v45  ;;  %v746_v0 = vadd.f32 %v745_v53, %v708_v48  ;;  %v737_v51 = vrot.slane %v736_v11, 1 }
 0x33f   :  { %v658_v62 = vadd.f32 %v657_v60, %v656_v47  ;;  %v740_v1 = vadd.f32 %v739_v61, %v705_v56  ;;  %v630_v2 = vpop.xlane.xlu1 %629  ;;  %v654_v47 = vadd.f32 %v653_v3, %v652_v18 }
 0x340   :  { %v665_v4 = vrot.slane %v664_v63, 1  ;;  %v747_v6 = vrot.slane %v746_v0, 2  ;;  %v673_v32 = vrot.slane %v630_v2, 4  ;;  %v627_v7 = vpop.xlane.xlu0 %626 }
 0x341   :  { %v659_v27 = vrot.slane %v658_v62, 1  ;;  %v741_v55 = vrot.slane %v740_v1, 2  ;;  %v667_v10 = vrot.slane %v627_v7, 4 }
 0x342   :  { %v666_v44 = vadd.f32 %v665_v4, %v664_v63  ;;  %v748_v5 = vadd.f32 %v747_v6, %v746_v0  ;;  %v674_v12 = vadd.f32 %v673_v32, %v630_v2  ;;  %v731_v63 = vrot.slane %v730_v13, 1 }
 0x343   :  { %v660_v40 = vadd.f32 %v659_v27, %v658_v62  ;;  %v742_v9 = vadd.f32 %v741_v55, %v740_v1  ;;  %v668_v15 = vadd.f32 %v667_v10, %v627_v7  ;;  %v714_v19 = vpop.xlane.xlu1 %713  ;;  %v738_v27 = vadd.f32 %v737_v51, %v736_v11  ;;  %v913_v11 = vld [vmem:[%s1382_s5 + $0x4] sm:$0x1] }
 0x344   :  { %v680_v20 = vadd.f32 %v666_v44, %v642_v49  ;;  %v749_v21 = vrot.slane %v748_v5, 1  ;;  %v675_v22 = vrot.slane %v674_v12, 2  ;;  %v757_v23 = vrot.slane %v714_v19, 4  ;;  %v711_v24 = vpop.xlane.xlu0 %710 }
 0x345   :  { %v679_v26 = vadd.f32 %v660_v40, %v636_v57  ;;  %v743_v30 = vrot.slane %v742_v9, 1  ;;  %v669_v33 = vrot.slane %v668_v15, 2  ;;  %v751_v34 = vrot.slane %v711_v24, 4 }
 0x346   :  { %v1297_v35 = vmul.f32 0.015625, %v680_v20  ;;  %v750_v36 = vadd.f32 %v749_v21, %v748_v5  ;;  %v676_v37 = vadd.f32 %v675_v22, %v674_v12  ;;  %v758_v39 = vadd.f32 %v757_v23, %v714_v19 }
 0x347   :  { %v1299_v42 = vmul.f32 0.015625, %v679_v26  ;;  %v744_v45 = vadd.f32 %v743_v30, %v742_v9  ;;  %v670_v16 = vadd.f32 %v669_v33, %v668_v15  ;;  %v752_v46 = vadd.f32 %v751_v34, %v711_v24  ;;  %v914_v24 = vld [vmem:[%s1382_s5 + $0x5] sm:$0x1] }
 0x348   :  { %v764_v48 = vadd.f32 %v750_v36, %v726_v59  ;;  %v648_v49 = vadd.f32 %v647_v8, %v646_v58  ;;  %v776_v53 = vmul.f32 %v1297_v35, %v1297_v35  ;;  %v677_v60 = vrot.slane %v676_v37, 1 }
 0x349   :  { %v763_v56 = vadd.f32 %v744_v45, %v720_v29  ;;  %v671_v61 = vrot.slane %v670_v16, 1  ;;  %v759_v38 = vrot.slane %v758_v39, 2  ;;  %v775_v0 = vmul.f32 %v1299_v42, %v1299_v42 }
 0x34a   :  { %v772_v57 = vmul.f32 0.015625, %v764_v48  ;;  %v753_v62 = vrot.slane %v752_v46, 2  ;;  %v678_v2 = vadd.f32 %v677_v60, %v676_v37  ;;  %v732_v55 = vadd.f32 %v731_v63, %v730_v13 }
 0x34b   :  { %v771_v54 = vmul.f32 0.015625, %v763_v56  ;;  %v672_v18 = vadd.f32 %v671_v61, %v670_v16  ;;  %v760_v59 = vadd.f32 %v759_v38, %v758_v39  ;;  %v806_v37 = vsub.f32 %v1241_v14, %v1297_v35  ;;  %v921_v14 = vld [vmem:[%s1383_s6 + $0x4] ss:$0 sm:$0xff] }
 0x34c   :  { %v780_v1 = vsub.f32 %v772_v57, %v776_v53  ;;  %v754_v3 = vadd.f32 %v753_v62, %v752_v46  ;;  %v682_v6 = vadd.f32 %v678_v2, %v654_v47  ;;  %v810_v39 = vsub.f32 %v1267_v41, %v1297_v35  ;;  %v922_v47 = vld [vmem:[%s1383_s6 + $0x5] ss:$0 sm:$0xff] }
 0x34d   :  { %v779_v58 = vsub.f32 %v771_v54, %v775_v0  ;;  %v681_v32 = vadd.f32 %v672_v18, %v648_v49  ;;  %v761_v29 = vrot.slane %v760_v59, 1  ;;  %v805_v16 = vsub.f32 %v1243_v17, %v1299_v42  ;;  %v924_v18 = vld [vmem:[%s1383_s6 + $0x7] ss:$0 sm:$0xff] }
 0x34e   :  { %v794_v4 = vadd.f32 1e-05, %v780_v1  ;;  %v755_v8 = vrot.slane %v754_v3, 1  ;;  %v770_v44 = vmul.f32 0.015625, %v682_v6  ;;  %v809_v46 = vsub.f32 %v1270_v43, %v1299_v42  ;;  %v916_v43 = vld [vmem:[%s1382_s5 + $0x7] sm:$0x1] }
 0x34f   :  { %v793_v7 = vadd.f32 1e-05, %v779_v58  ;;  %v762_v10 = vadd.f32 %v761_v29, %v760_v59  ;;  %v769_v5 = vmul.f32 0.015625, %v681_v32  ;;  %v915_v42 = vld [vmem:[%s1382_s5 + $0x6] sm:$0x1] }
 0x350   :  { %999 = vrsqrt.f32 %v794_v4  ;;  %v756_v12 = vadd.f32 %v755_v8, %v754_v3  ;;  %v778_v15 = vmul.f32 %v770_v44, %v770_v44  ;;  %v808_v0 = vsub.f32 %v1255_v28, %v770_v44  ;;  %v923_v28 = vld [vmem:[%s1383_s6 + $0x6] ss:$0 sm:$0xff] }
 0x351   :  { %1001 = vrsqrt.f32 %v793_v7  ;;  %v766_v40 = vadd.f32 %v762_v10, %v738_v27  ;;  %v777_v20 = vmul.f32 %v769_v5, %v769_v5  ;;  %v812_v54 = vsub.f32 %v1281_v50, %v770_v44 }
 0x352   :  { %v765_v9 = vadd.f32 %v756_v12, %v732_v55  ;;  %v807_v1 = vsub.f32 %v1257_v31, %v769_v5  ;;  %v811_v2 = vsub.f32 %v1284_v52, %v769_v5 }
 0x353   :  { %v774_v19 = vmul.f32 0.015625, %v766_v40 }
 0x354   :  { %v773_v21 = vmul.f32 0.015625, %v765_v9 }
 0x355   :  { %v782_v22 = vsub.f32 %v774_v19, %v778_v15 }
 0x356   :  { %v781_v23 = vsub.f32 %v773_v21, %v777_v20 }
 0x357   :  { %v796_v13 = vadd.f32 1e-05, %v782_v22 }
 0x358   :  { %v795_v26 = vadd.f32 1e-05, %v781_v23 }
 0x359   :  { %1003 = vrsqrt.f32 %v796_v13 }
 0x35a   :  { %v1000_v30 = vpop.eup %999  ;;  %1005 = vrsqrt.f32 %v795_v26 }
 0x35b   :  { %v1002_v33 = vpop.eup %1001  ;;  %v802_v34 = vmul.f32 %v1000_v30, %v914_v24 }
 0x35c   :  { %v801_v36 = vmul.f32 %v1002_v33, %v913_v11 }
 0x35d   :  { %v824_v45 = vrot.slane %v802_v34, %v1187_v25 }
 0x35e   :  { %v820_v48 = vrot.slane %v801_v36, %v1187_v25 }
 0x35f   :  { %v838_v49 = vmul.f32 %v824_v45, %v806_v37  ;;  %v842_v51 = vmul.f32 %v824_v45, %v810_v39 }
 0x360   :  { %v837_v41 = vmul.f32 %v820_v48, %v805_v16  ;;  %v841_v35 = vmul.f32 %v820_v48, %v809_v46 }
 0x361   :  { %v870_v53 = vadd.f32 %v922_v47, %v838_v49  ;;  %v874_v56 = vadd.f32 %v922_v47, %v842_v51 }
 0x362   :  { %v869_v17 = vadd.f32 %v921_v14, %v837_v41  ;;  %v873_v57 = vadd.f32 %v921_v14, %v841_v35 }
 0x363   :  { %878 = vst.msk [vmem:[%s1384_s7 + $0x8] sm:$0xff] %vm189_vm1, %v870_v53  ;;  %882 = vst.msk [vmem:[%s1384_s7 + $0x28] sm:$0xff] %vm189_vm1, %v874_v56  ;;  %v1004_v60 = vpop.eup %1003 }
 0x364   :  { %877 = vst.msk [vmem:[%s1384_s7] sm:$0xff] %vm189_vm1, %v869_v17  ;;  %881 = vst.msk [vmem:[%s1384_s7 + $0x20] sm:$0xff] %vm189_vm1, %v873_v57  ;;  %v1006_v61 = vpop.eup %1005  ;;  %v804_v38 = vmul.f32 %v1004_v60, %v916_v43 }
 0x365   :  { %v803_v63 = vmul.f32 %v1006_v61, %v915_v42 }
 0x366   :  { %v832_v62 = vrot.slane %v804_v38, %v1187_v25 }
 0x367   :  { %v828_v59 = vrot.slane %v803_v63, %v1187_v25 }
 0x368   :  { %v840_v58 = vmul.f32 %v832_v62, %v808_v0  ;;  %v844_v3 = vmul.f32 %v832_v62, %v812_v54 }
 0x369   :  { %v839_v4 = vmul.f32 %v828_v59, %v807_v1  ;;  %v843_v50 = vmul.f32 %v828_v59, %v811_v2 }
 0x36a   :  { %v872_v6 = vadd.f32 %v924_v18, %v840_v58  ;;  %v876_v32 = vadd.f32 %v924_v18, %v844_v3 }
 0x36b   :  { %v871_v29 = vadd.f32 %v923_v28, %v839_v4  ;;  %v875_v31 = vadd.f32 %v923_v28, %v843_v50 }
 0x36c   :  { %880 = vst.msk [vmem:[%s1384_s7 + $0x18] sm:$0xff] %vm189_vm1, %v872_v6  ;;  %884 = vst.msk [vmem:[%s1384_s7 + $0x38] sm:$0xff] %vm189_vm1, %v876_v32 }
 0x36d   :  { %879 = vst.msk [vmem:[%s1384_s7 + $0x10] sm:$0xff] %vm189_vm1, %v871_v29  ;;  %883 = vst.msk [vmem:[%s1384_s7 + $0x30] sm:$0xff] %vm189_vm1, %v875_v31 }
 0x36e   :  { %889 = vsyncpa [#allocation3], 1 }

</bundles_post_ra>
